<compile_context>
chip_gen: v6e
topology: v6e:2x2x1
jax: 0.10.0
libtpu: 0.0.40
codegen_flags: <defaults>
</compile_context>

<pallas_src>
import functools

import jax
import jax.numpy as jnp
from jax.experimental import pallas as pl
from jax.experimental.pallas import tpu as pltpu


# ---------------------------------------------------------------------------
# Pallas kernel: 3 conv levels + global average pool, fused.
# ---------------------------------------------------------------------------

def _fused_backbone_kernel(x_ref, w0_ref, b0_ref, w1_ref, b1_ref, wp_ref,
                           bp_ref, f0_ref, f1_ref, fp_ref, avg_ref,
                           *, n1, npool, enc):
    # x_ref:  (1, N0, 4*C) bf16 -- level-0 s2d rows, patch-major permuted:
    #         rows e*n1 + p hold patch element e of level-1 pixel p, and
    #         rows of level 1 are themselves ordered e'*npool + q w.r.t. the
    #         pool level, so every s2d below is a contiguous row-block slice.
    # w*_ref: (K, enc) bf16;  b*_ref: (1, enc) f32.
    # f*_ref: (1, N*, enc) bf16 feature maps (same permuted row order).
    # avg_ref:(1, 1, enc) f32  adaptive-avg-pooled 'pool' features.

    # Level '0': one MXU matmul over all pixels of this batch element.
    y0 = jnp.dot(x_ref[0], w0_ref[...], preferred_element_type=jnp.float32)
    y0 = jnp.maximum(y0 + b0_ref[...], 0.0)
    y0_bf = y0.astype(jnp.bfloat16)
    f0_ref[0] = y0_bf

    # Level '1': space-to-depth folded into 4 accumulated matmuls.  Row block
    # e of y0 holds patch element e of every level-1 pixel, so it pairs with
    # weight row block e (no reshape/transpose, no HBM round trip).
    acc = jnp.dot(y0_bf[0:n1, :], w1_ref[0:enc, :],
                  preferred_element_type=jnp.float32)
    for e in range(1, 4):
        acc = acc + jnp.dot(y0_bf[e * n1:(e + 1) * n1, :],
                            w1_ref[e * enc:(e + 1) * enc, :],
                            preferred_element_type=jnp.float32)
    y1 = jnp.maximum(acc + b1_ref[...], 0.0)
    y1_bf = y1.astype(jnp.bfloat16)
    f1_ref[0] = y1_bf

    # Level 'pool': same folded-s2d structure.
    acc = jnp.dot(y1_bf[0:npool, :], wp_ref[0:enc, :],
                  preferred_element_type=jnp.float32)
    for e in range(1, 4):
        acc = acc + jnp.dot(y1_bf[e * npool:(e + 1) * npool, :],
                            wp_ref[e * enc:(e + 1) * enc, :],
                            preferred_element_type=jnp.float32)
    yp = jnp.maximum(acc + bp_ref[...], 0.0)
    fp_ref[0] = yp.astype(jnp.bfloat16)

    # Fused adaptive_avg_pool2d(.., (1, 1)) from the f32 accumulator
    # (avoids a bf16 round-trip and an f32-input MXU matmul).
    avg_ref[0] = jnp.sum(yp, axis=0, keepdims=True) * (1.0 / npool)


def fused_backbone(x0, kparams, *, batch, n0, n1, npool, enc):
    """Run the fused 3-level backbone + average pool.

    x0: (B, n0, 4*C) bf16 pre-permuted level-0 s2d input.
    kparams: ((w0,b0),(w1,b1),(wp,bp)) with w* bf16, b* (1,enc) f32.
    """
    (w0, b0), (w1, b1), (wp, bp) = kparams
    c4 = x0.shape[-1]
    kernel = functools.partial(_fused_backbone_kernel,
                               n1=n1, npool=npool, enc=enc)
    cost = pl.CostEstimate(
        flops=2 * batch * (n0 * c4 * enc + (n1 + npool) * 4 * enc * enc),
        transcendentals=0,
        bytes_accessed=(batch * n0 * c4 + (c4 + 8 * enc) * enc
                        + batch * (n0 + n1 + npool) * enc) * 2
                       + (3 * enc + batch * enc) * 4,
    )
    return pl.pallas_call(
        kernel,
        out_shape=(
            jax.ShapeDtypeStruct((batch, n0, enc), jnp.bfloat16),
            jax.ShapeDtypeStruct((batch, n1, enc), jnp.bfloat16),
            jax.ShapeDtypeStruct((batch, npool, enc), jnp.bfloat16),
            jax.ShapeDtypeStruct((batch, 1, enc), jnp.float32),
        ),
        grid=(batch,),
        in_specs=[
            pl.BlockSpec((1, n0, c4), lambda b: (b, 0, 0)),
            pl.BlockSpec((c4, enc), lambda b: (0, 0)),       # resident weights
            pl.BlockSpec((1, enc), lambda b: (0, 0)),
            pl.BlockSpec((4 * enc, enc), lambda b: (0, 0)),
            pl.BlockSpec((1, enc), lambda b: (0, 0)),
            pl.BlockSpec((4 * enc, enc), lambda b: (0, 0)),
            pl.BlockSpec((1, enc), lambda b: (0, 0)),
        ],
        out_specs=(
            pl.BlockSpec((1, n0, enc), lambda b: (b, 0, 0)),
            pl.BlockSpec((1, n1, enc), lambda b: (b, 0, 0)),
            pl.BlockSpec((1, npool, enc), lambda b: (b, 0, 0)),
            pl.BlockSpec((1, 1, enc), lambda b: (b, 0, 0)),
        ),
        compiler_params=pltpu.CompilerParams(
            dimension_semantics=("parallel",),
            vmem_limit_bytes=32 * 1024 * 1024,   # safe on v7x (64 MiB) too
        ),
        cost_estimate=cost,
    )(x0, w0, b0, w1, b1, wp, bp)


# ---------------------------------------------------------------------------
# Layout plumbing (tiny XLA ops at the kernel boundary only).
# ---------------------------------------------------------------------------
# Row ordering used inside the kernel for level-0 rows:
#   r = e0 * N1 + p,  p = e1 * Npool + q,  q = ip*(W//8) + jp
# where e0/e1 are the 2x2 patch elements (order (0,0),(0,1),(1,0),(1,1)) at
# levels 0/1 and (ip, jp) is the pool-level pixel (row-major).

def _pack_level0_input(x_nchw):
    B, C, H, W = x_nchw.shape
    x = jnp.transpose(x_nchw, (0, 2, 3, 1))                       # NHWC
    # h = ip*8 + d1i*4 + d0i*2 + di ; w = jp*8 + d1j*4 + d0j*2 + dj
    x = x.reshape(B, H // 8, 2, 2, 2, W // 8, 2, 2, 2, C)
    # dims: (B, ip, d1i, d0i, di, jp, d1j, d0j, dj, C)
    x = jnp.transpose(x, (0, 3, 7, 2, 6, 1, 5, 4, 8, 9))
    # dims: (B, d0i, d0j, d1i, d1j, ip, jp, di, dj, C)
    return x.reshape(B, (H // 2) * (W // 2), 4 * C).astype(jnp.bfloat16)


def _unpack_feat0(y, H, W):
    B, _, E = y.shape
    y = y.reshape(B, 2, 2, 2, 2, H // 8, W // 8, E)
    # dims: (B, d0i, d0j, d1i, d1j, ip, jp, E); oi = ip*4 + d1i*2 + d0i
    y = jnp.transpose(y, (0, 5, 3, 1, 6, 4, 2, 7))
    y = y.reshape(B, H // 2, W // 2, E)
    return jnp.transpose(y, (0, 3, 1, 2))                         # NCHW


def _unpack_feat1(y, H, W):
    B, _, E = y.shape
    y = y.reshape(B, 2, 2, H // 8, W // 8, E)
    # dims: (B, d1i, d1j, ip, jp, E); i1 = ip*2 + d1i
    y = jnp.transpose(y, (0, 3, 1, 4, 2, 5))
    y = y.reshape(B, H // 4, W // 4, E)
    return jnp.transpose(y, (0, 3, 1, 2))


def _unpack_featp(y, H, W):
    B, _, E = y.shape
    y = y.reshape(B, H // 8, W // 8, E)
    return jnp.transpose(y, (0, 3, 1, 2))


# ---------------------------------------------------------------------------
# Synthetic deterministic backbone parameters (the PyTorch backbone is an
# injected module; we synthesize an FPN-like stand-in with levels 0/1/pool).
# ---------------------------------------------------------------------------

def init_backbone_params(key, c_in, enc_hid):
    params = {}
    in_dims = {'0': 4 * c_in, '1': 4 * enc_hid, 'pool': 4 * enc_hid}
    for name in ('0', '1', 'pool'):
        key, kw, kb = jax.random.split(key, 3)
        k_in = in_dims[name]
        w = jax.random.normal(kw, (k_in, enc_hid), jnp.float32) / jnp.sqrt(k_in)
        b = jax.random.normal(kb, (enc_hid,), jnp.float32) * 0.01
        params[name] = (w, b)
    return params


# ---------------------------------------------------------------------------
# Forward pass (matches FasterRCNNEncoder.forward semantics).
# ---------------------------------------------------------------------------

def faster_rcnn_encoder_forward(x_nchw, params):
    """Returns (list_of_NCHW_feature_maps, averaged_x [B, enc_hid], None)."""
    B, C, H, W = x_nchw.shape
    assert H % 8 == 0 and W % 8 == 0, "three stride-2 levels need H, W % 8 == 0"
    enc = params['0'][0].shape[1]
    n0 = (H // 2) * (W // 2)
    n1 = (H // 4) * (W // 4)
    npool = (H // 8) * (W // 8)

    x0 = _pack_level0_input(x_nchw)
    kparams = tuple(
        (w.astype(jnp.bfloat16), b.reshape(1, -1).astype(jnp.float32))
        for w, b in (params['0'], params['1'], params['pool']))

    f0, f1, fp, avg = fused_backbone(x0, kparams, batch=B, n0=n0, n1=n1,
                                     npool=npool, enc=enc)

    feats = [
        _unpack_feat0(f0.astype(jnp.float32), H, W),
        _unpack_feat1(f1.astype(jnp.float32), H, W),
        _unpack_featp(fp.astype(jnp.float32), H, W),
    ]
    averaged_x = avg.reshape(B, enc)
    return feats, averaged_x, None


# ---------------------------------------------------------------------------
# Pure-JAX reference (same numerics: bf16 operands, f32 accumulation).
# ---------------------------------------------------------------------------

def _space_to_depth_ref(x):
    B, H, W, C = x.shape
    x = x.reshape(B, H // 2, 2, W // 2, 2, C)
    x = jnp.transpose(x, (0, 1, 3, 2, 4, 5))
    return x.reshape(B, H // 2, W // 2, 4 * C)


def reference_forward(x_nchw, params):
    h = jnp.transpose(x_nchw, (0, 2, 3, 1)).astype(jnp.bfloat16)
    feats = []
    for name in ('0', '1', 'pool'):
        w, b = params[name]
        hs = _space_to_depth_ref(h)
        B, Hh, Ww, K = hs.shape
        y = jnp.dot(hs.reshape(B * Hh * Ww, K), w.astype(jnp.bfloat16),
                    preferred_element_type=jnp.float32)
        y = jnp.maximum(y + b[None, :], 0.0).reshape(B, Hh, Ww, -1)
        feats.append(y)
        h = y.astype(jnp.bfloat16)
    pooled = jnp.mean(feats[-1], axis=(1, 2))
    feats_nchw = [jnp.transpose(f, (0, 3, 1, 2)) for f in feats]
    return feats_nchw, pooled


# ---------------------------------------------------------------------------
# Main
# ---------------------------------------------------------------------------

if __name__ == "__main__":
    B, C_IN, H, W = 2, 4, 16, 16
    ENC_HID = 32

    key = jax.random.PRNGKey(0)
    k_x, k_p = jax.random.split(key)
    x = jax.random.normal(k_x, (B, C_IN, H, W), jnp.float32)       # NCHW input
    params = init_backbone_params(k_p, C_IN, ENC_HID)

    fwd = jax.jit(faster_rcnn_encoder_forward)
    feat_list, averaged_x, none_out = fwd(x, params)
    jax.block_until_ready(averaged_x)
    jax.block_until_ready(feat_list)

    # Shape checks implied by the PyTorch forward.
    assert none_out is None
    assert averaged_x.shape == (B, ENC_HID)
    assert feat_list[0].shape == (B, ENC_HID, H // 2, W // 2)
    assert feat_list[1].shape == (B, ENC_HID, H // 4, W // 4)
    assert feat_list[2].shape == (B, ENC_HID, H // 8, W // 8)

    # Numerical check against the pure-JAX reference (kernel feature maps are
    # bf16-rounded; averaged_x is f32 from the pre-cast accumulator).
    ref_feats, ref_avg = reference_forward(x, params)
    for got, ref in zip(feat_list, ref_feats):
        err = float(jnp.max(jnp.abs(got - ref)))
        assert err < 5e-2, f"feature map mismatch: {err}"
    err = float(jnp.max(jnp.abs(averaged_x - ref_avg)))
    assert err < 1e-2, f"averaged_x mismatch: {err}"

    # averaged_x must also equal the mean of the returned 'pool' feature map
    # (up to bf16 rounding of the stored map).
    pool_mean = jnp.mean(feat_list[2], axis=(2, 3))
    assert float(jnp.max(jnp.abs(averaged_x - pool_mean))) < 2e-2

    print("KERNEL_OK")
</pallas_src>

<mosaic_0001>
module attributes {stable_mosaic.version = 11 : i64} {
  func.func @_fused_backbone_kernel(%arg0: i32, %arg1: memref<1x64x16xbf16, #tpu.memory_space<vmem>>, %arg2: memref<16x32xbf16, #tpu.memory_space<vmem>>, %arg3: memref<1x32xf32, #tpu.memory_space<vmem>>, %arg4: memref<128x32xbf16, #tpu.memory_space<vmem>>, %arg5: memref<1x32xf32, #tpu.memory_space<vmem>>, %arg6: memref<128x32xbf16, #tpu.memory_space<vmem>>, %arg7: memref<1x32xf32, #tpu.memory_space<vmem>>, %arg8: memref<1x64x32xbf16, #tpu.memory_space<vmem>>, %arg9: memref<1x16x32xbf16, #tpu.memory_space<vmem>>, %arg10: memref<1x4x32xbf16, #tpu.memory_space<vmem>>, %arg11: memref<1x1x32xf32, #tpu.memory_space<vmem>>) attributes {dimension_semantics = [#tpu.dimension_semantics<parallel>], iteration_bounds = array<i64: 2>, scalar_prefetch = 0 : i64, scratch_operands = 0 : i64, tpu.core_type = #tpu.core_type<tc>, window_params = [{transform_indices = @transform_0, window_bounds = array<i64: 1, 64, 16>}, {pipeline_mode = #tpu.pipeline_mode<synchronous>, transform_indices = @transform_1, window_bounds = array<i64: 16, 32>}, {pipeline_mode = #tpu.pipeline_mode<synchronous>, transform_indices = @transform_2, window_bounds = array<i64: 1, 32>}, {pipeline_mode = #tpu.pipeline_mode<synchronous>, transform_indices = @transform_3, window_bounds = array<i64: 128, 32>}, {pipeline_mode = #tpu.pipeline_mode<synchronous>, transform_indices = @transform_4, window_bounds = array<i64: 1, 32>}, {pipeline_mode = #tpu.pipeline_mode<synchronous>, transform_indices = @transform_5, window_bounds = array<i64: 128, 32>}, {pipeline_mode = #tpu.pipeline_mode<synchronous>, transform_indices = @transform_6, window_bounds = array<i64: 1, 32>}, {transform_indices = @transform_7, window_bounds = array<i64: 1, 64, 32>}, {transform_indices = @transform_8, window_bounds = array<i64: 1, 16, 32>}, {transform_indices = @transform_9, window_bounds = array<i64: 1, 4, 32>}, {transform_indices = @transform_10, window_bounds = array<i64: 1, 1, 32>}]} {
    %c0 = arith.constant 0 : index
    %c0_0 = arith.constant 0 : index
    %c0_1 = arith.constant 0 : index
    %0 = vector.load %arg1[%c0, %c0_0, %c0_1] : memref<1x64x16xbf16, #tpu.memory_space<vmem>>, vector<1x64x16xbf16>
    %1 = vector.shape_cast %0 : vector<1x64x16xbf16> to vector<64x16xbf16>
    %c0_2 = arith.constant 0 : index
    %c0_3 = arith.constant 0 : index
    %2 = vector.load %arg2[%c0_2, %c0_3] : memref<16x32xbf16, #tpu.memory_space<vmem>>, vector<16x32xbf16>
    %cst = arith.constant dense<0.000000e+00> : vector<64x32xf32>
    %3 = tpu.matmul %1, %2, %cst {dimension_numbers = #tpu.dot_dimension_numbers<[1], [0], [0], [1], [0, 0, 1, 1], [], []>} : vector<64x16xbf16>, vector<16x32xbf16>, vector<64x32xf32> -> vector<64x32xf32>
    %c0_4 = arith.constant 0 : index
    %c0_5 = arith.constant 0 : index
    %4 = vector.load %arg3[%c0_4, %c0_5] : memref<1x32xf32, #tpu.memory_space<vmem>>, vector<1x32xf32>
    %5 = vector.broadcast %4 : vector<1x32xf32> to vector<64x32xf32>
    %6 = arith.addf %3, %5 : vector<64x32xf32>
    %cst_6 = arith.constant 0.000000e+00 : f32
    %7 = vector.broadcast %cst_6 : f32 to vector<64x32xf32>
    %8 = arith.maximumf %6, %7 : vector<64x32xf32>
    %9 = arith.truncf %8 : vector<64x32xf32> to vector<64x32xbf16>
    %c0_7 = arith.constant 0 : index
    %c0_8 = arith.constant 0 : index
    %c0_9 = arith.constant 0 : index
    %10 = vector.load %arg8[%c0_7, %c0_8, %c0_9] : memref<1x64x32xbf16, #tpu.memory_space<vmem>>, vector<1x64x32xbf16>
    %11 = vector.shape_cast %10 : vector<1x64x32xbf16> to vector<64x32xbf16>
    %12 = vector.shape_cast %9 : vector<64x32xbf16> to vector<1x64x32xbf16>
    tpu.vector_store %arg8[%c0_7, %c0_8, %c0_9], %12 {strides = array<i32>} : memref<1x64x32xbf16, #tpu.memory_space<vmem>>, vector<1x64x32xbf16>,
    %13 = vector.extract_strided_slice %9 {offsets = [0, 0], sizes = [16, 32], strides = [1, 1]} : vector<64x32xbf16> to vector<16x32xbf16>
    %c0_10 = arith.constant 0 : index
    %c0_11 = arith.constant 0 : index
    %14 = vector.load %arg4[%c0_10, %c0_11] : memref<128x32xbf16, #tpu.memory_space<vmem>>, vector<32x32xbf16>
    %cst_12 = arith.constant dense<0.000000e+00> : vector<16x32xf32>
    %15 = tpu.matmul %13, %14, %cst_12 {dimension_numbers = #tpu.dot_dimension_numbers<[1], [0], [0], [1], [0, 0, 1, 1], [], []>} : vector<16x32xbf16>, vector<32x32xbf16>, vector<16x32xf32> -> vector<16x32xf32>
    %16 = vector.extract_strided_slice %9 {offsets = [16, 0], sizes = [16, 32], strides = [1, 1]} : vector<64x32xbf16> to vector<16x32xbf16>
    %c32 = arith.constant 32 : index
    %c0_13 = arith.constant 0 : index
    %17 = vector.load %arg4[%c32, %c0_13] : memref<128x32xbf16, #tpu.memory_space<vmem>>, vector<32x32xbf16>
    %cst_14 = arith.constant dense<0.000000e+00> : vector<16x32xf32>
    %18 = tpu.matmul %16, %17, %cst_14 {dimension_numbers = #tpu.dot_dimension_numbers<[1], [0], [0], [1], [0, 0, 1, 1], [], []>} : vector<16x32xbf16>, vector<32x32xbf16>, vector<16x32xf32> -> vector<16x32xf32>
    %19 = arith.addf %15, %18 : vector<16x32xf32>
    %20 = vector.extract_strided_slice %9 {offsets = [32, 0], sizes = [16, 32], strides = [1, 1]} : vector<64x32xbf16> to vector<16x32xbf16>
    %c64 = arith.constant 64 : index
    %c0_15 = arith.constant 0 : index
    %21 = vector.load %arg4[%c64, %c0_15] : memref<128x32xbf16, #tpu.memory_space<vmem>>, vector<32x32xbf16>
    %cst_16 = arith.constant dense<0.000000e+00> : vector<16x32xf32>
    %22 = tpu.matmul %20, %21, %cst_16 {dimension_numbers = #tpu.dot_dimension_numbers<[1], [0], [0], [1], [0, 0, 1, 1], [], []>} : vector<16x32xbf16>, vector<32x32xbf16>, vector<16x32xf32> -> vector<16x32xf32>
    %23 = arith.addf %19, %22 : vector<16x32xf32>
    %24 = vector.extract_strided_slice %9 {offsets = [48, 0], sizes = [16, 32], strides = [1, 1]} : vector<64x32xbf16> to vector<16x32xbf16>
    %c96 = arith.constant 96 : index
    %c0_17 = arith.constant 0 : index
    %25 = vector.load %arg4[%c96, %c0_17] : memref<128x32xbf16, #tpu.memory_space<vmem>>, vector<32x32xbf16>
    %cst_18 = arith.constant dense<0.000000e+00> : vector<16x32xf32>
    %26 = tpu.matmul %24, %25, %cst_18 {dimension_numbers = #tpu.dot_dimension_numbers<[1], [0], [0], [1], [0, 0, 1, 1], [], []>} : vector<16x32xbf16>, vector<32x32xbf16>, vector<16x32xf32> -> vector<16x32xf32>
    %27 = arith.addf %23, %26 : vector<16x32xf32>
    %c0_19 = arith.constant 0 : index
    %c0_20 = arith.constant 0 : index
    %28 = vector.load %arg5[%c0_19, %c0_20] : memref<1x32xf32, #tpu.memory_space<vmem>>, vector<1x32xf32>
    %29 = vector.broadcast %28 : vector<1x32xf32> to vector<16x32xf32>
    %30 = arith.addf %27, %29 : vector<16x32xf32>
    %cst_21 = arith.constant 0.000000e+00 : f32
    %31 = vector.broadcast %cst_21 : f32 to vector<16x32xf32>
    %32 = arith.maximumf %30, %31 : vector<16x32xf32>
    %33 = arith.truncf %32 : vector<16x32xf32> to vector<16x32xbf16>
    %c0_22 = arith.constant 0 : index
    %c0_23 = arith.constant 0 : index
    %c0_24 = arith.constant 0 : index
    %34 = vector.load %arg9[%c0_22, %c0_23, %c0_24] : memref<1x16x32xbf16, #tpu.memory_space<vmem>>, vector<1x16x32xbf16>
    %35 = vector.shape_cast %34 : vector<1x16x32xbf16> to vector<16x32xbf16>
    %36 = vector.shape_cast %33 : vector<16x32xbf16> to vector<1x16x32xbf16>
    tpu.vector_store %arg9[%c0_22, %c0_23, %c0_24], %36 {strides = array<i32>} : memref<1x16x32xbf16, #tpu.memory_space<vmem>>, vector<1x16x32xbf16>,
    %37 = vector.extract_strided_slice %33 {offsets = [0, 0], sizes = [4, 32], strides = [1, 1]} : vector<16x32xbf16> to vector<4x32xbf16>
    %c0_25 = arith.constant 0 : index
    %c0_26 = arith.constant 0 : index
    %38 = vector.load %arg6[%c0_25, %c0_26] : memref<128x32xbf16, #tpu.memory_space<vmem>>, vector<32x32xbf16>
    %cst_27 = arith.constant dense<0.000000e+00> : vector<4x32xf32>
    %39 = tpu.matmul %37, %38, %cst_27 {dimension_numbers = #tpu.dot_dimension_numbers<[1], [0], [0], [1], [0, 0, 1, 1], [], []>} : vector<4x32xbf16>, vector<32x32xbf16>, vector<4x32xf32> -> vector<4x32xf32>
    %40 = vector.extract_strided_slice %33 {offsets = [4, 0], sizes = [4, 32], strides = [1, 1]} : vector<16x32xbf16> to vector<4x32xbf16>
    %c32_28 = arith.constant 32 : index
    %c0_29 = arith.constant 0 : index
    %41 = vector.load %arg6[%c32_28, %c0_29] : memref<128x32xbf16, #tpu.memory_space<vmem>>, vector<32x32xbf16>
    %cst_30 = arith.constant dense<0.000000e+00> : vector<4x32xf32>
    %42 = tpu.matmul %40, %41, %cst_30 {dimension_numbers = #tpu.dot_dimension_numbers<[1], [0], [0], [1], [0, 0, 1, 1], [], []>} : vector<4x32xbf16>, vector<32x32xbf16>, vector<4x32xf32> -> vector<4x32xf32>
    %43 = arith.addf %39, %42 : vector<4x32xf32>
    %44 = vector.extract_strided_slice %33 {offsets = [8, 0], sizes = [4, 32], strides = [1, 1]} : vector<16x32xbf16> to vector<4x32xbf16>
    %c64_31 = arith.constant 64 : index
    %c0_32 = arith.constant 0 : index
    %45 = vector.load %arg6[%c64_31, %c0_32] : memref<128x32xbf16, #tpu.memory_space<vmem>>, vector<32x32xbf16>
    %cst_33 = arith.constant dense<0.000000e+00> : vector<4x32xf32>
    %46 = tpu.matmul %44, %45, %cst_33 {dimension_numbers = #tpu.dot_dimension_numbers<[1], [0], [0], [1], [0, 0, 1, 1], [], []>} : vector<4x32xbf16>, vector<32x32xbf16>, vector<4x32xf32> -> vector<4x32xf32>
    %47 = arith.addf %43, %46 : vector<4x32xf32>
    %48 = vector.extract_strided_slice %33 {offsets = [12, 0], sizes = [4, 32], strides = [1, 1]} : vector<16x32xbf16> to vector<4x32xbf16>
    %c96_34 = arith.constant 96 : index
    %c0_35 = arith.constant 0 : index
    %49 = vector.load %arg6[%c96_34, %c0_35] : memref<128x32xbf16, #tpu.memory_space<vmem>>, vector<32x32xbf16>
    %cst_36 = arith.constant dense<0.000000e+00> : vector<4x32xf32>
    %50 = tpu.matmul %48, %49, %cst_36 {dimension_numbers = #tpu.dot_dimension_numbers<[1], [0], [0], [1], [0, 0, 1, 1], [], []>} : vector<4x32xbf16>, vector<32x32xbf16>, vector<4x32xf32> -> vector<4x32xf32>
    %51 = arith.addf %47, %50 : vector<4x32xf32>
    %c0_37 = arith.constant 0 : index
    %c0_38 = arith.constant 0 : index
    %52 = vector.load %arg7[%c0_37, %c0_38] : memref<1x32xf32, #tpu.memory_space<vmem>>, vector<1x32xf32>
    %53 = vector.broadcast %52 : vector<1x32xf32> to vector<4x32xf32>
    %54 = arith.addf %51, %53 : vector<4x32xf32>
    %cst_39 = arith.constant 0.000000e+00 : f32
    %55 = vector.broadcast %cst_39 : f32 to vector<4x32xf32>
    %56 = arith.maximumf %54, %55 : vector<4x32xf32>
    %57 = arith.truncf %56 : vector<4x32xf32> to vector<4x32xbf16>
    %c0_40 = arith.constant 0 : index
    %c0_41 = arith.constant 0 : index
    %c0_42 = arith.constant 0 : index
    %58 = vector.load %arg10[%c0_40, %c0_41, %c0_42] : memref<1x4x32xbf16, #tpu.memory_space<vmem>>, vector<1x4x32xbf16>
    %59 = vector.shape_cast %58 : vector<1x4x32xbf16> to vector<4x32xbf16>
    %60 = vector.shape_cast %57 : vector<4x32xbf16> to vector<1x4x32xbf16>
    tpu.vector_store %arg10[%c0_40, %c0_41, %c0_42], %60 {strides = array<i32>} : memref<1x4x32xbf16, #tpu.memory_space<vmem>>, vector<1x4x32xbf16>,
    %cst_43 = arith.constant dense<0.000000e+00> : vector<32xf32>
    %61 = vector.multi_reduction <add>, %56, %cst_43 [0] : vector<4x32xf32> to vector<32xf32>
    %62 = vector.shape_cast %61 : vector<32xf32> to vector<1x32xf32>
    %cst_44 = arith.constant 2.500000e-01 : f32
    %63 = vector.broadcast %cst_44 : f32 to vector<1x32xf32>
    %64 = arith.mulf %62, %63 : vector<1x32xf32>
    %c0_45 = arith.constant 0 : index
    %c0_46 = arith.constant 0 : index
    %c0_47 = arith.constant 0 : index
    %65 = vector.load %arg11[%c0_45, %c0_46, %c0_47] : memref<1x1x32xf32, #tpu.memory_space<vmem>>, vector<1x1x32xf32>
    %66 = vector.shape_cast %65 : vector<1x1x32xf32> to vector<1x32xf32>
    %67 = vector.shape_cast %64 : vector<1x32xf32> to vector<1x1x32xf32>
    tpu.vector_store %arg11[%c0_45, %c0_46, %c0_47], %67 {strides = array<i32>} : memref<1x1x32xf32, #tpu.memory_space<vmem>>, vector<1x1x32xf32>,
    return
  }
  func.func @transform_0(%arg0: i32) -> (i32, i32, i32) {
    %c0_i32 = arith.constant 0 : i32
    %c0_i32_0 = arith.constant 0 : i32
    %c0_i32_1 = arith.constant 0 : i32
    return %arg0, %c0_i32, %c0_i32_0 : i32, i32, i32
  }
  func.func @transform_1(%arg0: i32) -> (i32, i32) {
    %c0_i32 = arith.constant 0 : i32
    %c0_i32_0 = arith.constant 0 : i32
    %c0_i32_1 = arith.constant 0 : i32
    return %c0_i32, %c0_i32_0 : i32, i32
  }
  func.func @transform_2(%arg0: i32) -> (i32, i32) {
    %c0_i32 = arith.constant 0 : i32
    %c0_i32_0 = arith.constant 0 : i32
    %c0_i32_1 = arith.constant 0 : i32
    return %c0_i32, %c0_i32_0 : i32, i32
  }
  func.func @transform_3(%arg0: i32) -> (i32, i32) {
    %c0_i32 = arith.constant 0 : i32
    %c0_i32_0 = arith.constant 0 : i32
    %c0_i32_1 = arith.constant 0 : i32
    return %c0_i32, %c0_i32_0 : i32, i32
  }
  func.func @transform_4(%arg0: i32) -> (i32, i32) {
    %c0_i32 = arith.constant 0 : i32
    %c0_i32_0 = arith.constant 0 : i32
    %c0_i32_1 = arith.constant 0 : i32
    return %c0_i32, %c0_i32_0 : i32, i32
  }
  func.func @transform_5(%arg0: i32) -> (i32, i32) {
    %c0_i32 = arith.constant 0 : i32
    %c0_i32_0 = arith.constant 0 : i32
    %c0_i32_1 = arith.constant 0 : i32
    return %c0_i32, %c0_i32_0 : i32, i32
  }
  func.func @transform_6(%arg0: i32) -> (i32, i32) {
    %c0_i32 = arith.constant 0 : i32
    %c0_i32_0 = arith.constant 0 : i32
    %c0_i32_1 = arith.constant 0 : i32
    return %c0_i32, %c0_i32_0 : i32, i32
  }
  func.func @transform_7(%arg0: i32) -> (i32, i32, i32) {
    %c0_i32 = arith.constant 0 : i32
    %c0_i32_0 = arith.constant 0 : i32
    %c0_i32_1 = arith.constant 0 : i32
    return %arg0, %c0_i32, %c0_i32_0 : i32, i32, i32
  }
  func.func @transform_8(%arg0: i32) -> (i32, i32, i32) {
    %c0_i32 = arith.constant 0 : i32
    %c0_i32_0 = arith.constant 0 : i32
    %c0_i32_1 = arith.constant 0 : i32
    return %arg0, %c0_i32, %c0_i32_0 : i32, i32, i32
  }
  func.func @transform_9(%arg0: i32) -> (i32, i32, i32) {
    %c0_i32 = arith.constant 0 : i32
    %c0_i32_0 = arith.constant 0 : i32
    %c0_i32_1 = arith.constant 0 : i32
    return %arg0, %c0_i32, %c0_i32_0 : i32, i32, i32
  }
  func.func @transform_10(%arg0: i32) -> (i32, i32, i32) {
    %c0_i32 = arith.constant 0 : i32
    %c0_i32_0 = arith.constant 0 : i32
    %c0_i32_1 = arith.constant 0 : i32
    return %arg0, %c0_i32, %c0_i32_0 : i32, i32, i32
  }
}

</mosaic_0001>

<bundles_post_ra>
// kernel: faster_rcnn_encoder_forward.1
= control target key start
LH: loop header
LB: loop body
LE: loop exit
PB: predicated region body
PF: predicated region fallthrough
CT: control target
= control target key end

     0   :  { %s1841_s0 = inlined_call_operand.vmem [shape: bf16[2,64,16], index: 0, kind: input, shape index: {}]   ;;  %s1842_s1 = inlined_call_operand.vmem [shape: bf16[16,32], index: 1, kind: input, shape index: {}]   ;;  %s1843_s2 = inlined_call_operand.vmem [shape: f32[1,32], index: 2, kind: input, shape index: {}]   ;;  %s1844_s3 = inlined_call_operand.vmem [shape: bf16[128,32], index: 3, kind: input, shape index: {}]   ;;  %s1845_s4 = inlined_call_operand.vmem [shape: f32[1,32], index: 4, kind: input, shape index: {}]   ;;  %s1846_s5 = inlined_call_operand.vmem [shape: bf16[128,32], index: 5, kind: input, shape index: {}]   ;;  %s1847_s6 = inlined_call_operand.vmem [shape: f32[1,32], index: 6, kind: input, shape index: {}]   ;;  %s1848_s7 = inlined_call_operand.vmem [shape: bf16[2,64,32], index: 7, kind: output, shape index: {0}]   ;;  %s1849_s8 = inlined_call_operand.vmem [shape: bf16[2,16,32], index: 8, kind: output, shape index: {1}]   ;;  %s1850_s9 = inlined_call_operand.vmem [shape: bf16[2,4,32], index: 9, kind: output, shape index: {2}]   ;;  %s1851_s10 = inlined_call_operand.hbm [shape: f32[2,1,32], index: 10, kind: output, shape index: {3}]  }
   0x1   :  { %1852 = sst [smem:[#allocation5_spill]] %s1841_s0 }
   0x2   :  { %16 = vsyncpa [#allocation3], 0 }
   0x3   :  { %18 = vsyncpa [#allocation3 + $0x1], 0  ;;  %s1615_s13 = smov 0   ;;  %s1617_s14 = smov 0  }
   0x4   :  { %s1619_s15 = smov 0   ;;  %s1621_s16 = smov 0  }
   0x5 LB: > { %s1636_s17 = sadd.s32 4294967295, %s1555_s16   ;;  %s1257_s18 = sadd.s32 4294967294, %s1555_s16   ;;  %s1555_s16 = sphi %s1621_s16, %s1859_s16   ;;  %s1551_s15 = sphi %s1619_s15, %s1858_s15   ;;  %s1547_s14 = sphi %s1617_s14, %s1857_s14   ;;  %s1543_s13 = sphi %s1615_s13, %s1856_s13  }
   0x6   : > { %s1640_s19 = sadd.s32 1, %s1555_s16   ;;  %s261_s20 = sadd.s32 1, %s1551_s15 }
   0x7   : > { %s258_s21 = ssub.s32 %s1555_s16, %s1640_s19  ;;  %p271_p0 = scmp.ne.s32.totalorder %s1551_s15, %s1547_s14 }
   0x8   : > { %p259_p1 = scmp.eq.s32.totalorder %s258_s21, 0  ;;  %p272_p2 = scmp.eq.s32.totalorder %s1636_s17, 1 }
   0x9   : > { %p277_p3 = scmp.ne.s32.totalorder %s1547_s14, %s1543_s13  ;;  %p278_p4 = scmp.eq.s32.totalorder %s1257_s18, 1 }
   0xa   : > { %s1651_s22 = scalar_select %p259_p1, %s1551_s15, %s261_s20  }
   0xb   : > { %p1653_p5 = por %p272_p2, %p271_p0  ;;  %p1657_p6 = por %p278_p4, %p277_p3 }
   0xc   : > { %p1260_p7 = scmp.ge.s32.totalorder %s1555_s16, 1  ;;  %p322_p8 = scmp.lt.s32.totalorder %s1555_s16, 3 }
   0xe   : > { %p323_p9 = pnand %p1260_p7, %p322_p8 }
   0xf   : > { %p373_p10 = scmp.lt.s32.totalorder (!%p323_p9), %s1636_s17, 1  ;;  %s1855_s0 = sld [smem:[#allocation5_spill]] (!%p323_p9) }
  0x10   : > { %326 = sbr.rel (%p323_p9) target bundleno = 690 (0x2b2), region = 48  ;;  %s371_s12 = sand.u32 (!%p323_p9), 1, %s1547_s14  }
  0x11   : > { %s372_s18 = scalar_lea.vmem (!%p323_p9), [#allocation2], %s371_s12  ;;  %s1559_s30 = smov (!%p323_p9), [#allocation2]  }
  0x15   : > { %v1474_v0 = vld [vmem:[%s1842_s1] sm:$0xff]   ;;  %s1668_s27 = scalar_select %p373_p10, %s1636_s17, 1  ;;  %vm436_vm0 = vcmask 130048   ;;  %v1479_v5 = vld [vmem:[%s1844_s3 + $0x18] sm:$0xff]   ;;  %v1557_v6 = vmov 0.0   ;;  %v1480_v7 = vld [vmem:[%s1844_s3 + $0x10] sm:$0xff]  }
  0x16   : > { %1359 = vmatprep.subr.bf16.mxu0 %v1474_v0  ;;  %1369 = vmatprep.subr.bf16.mxu1 %v1557_v6  ;;  %vm1558_vm1 = vmmov 0   ;;  %v1481_v8 = vld [vmem:[%s1844_s3 + $0x28] sm:$0xff]   ;;  %v1484_v9 = vld [vmem:[%s1844_s3 + $0x20] sm:$0xff]   ;;  %vm554_vm2 = vcmask 257024   ;;  %vm583_vm3 = vcmask 261120   ;;  %v1485_v43 = vld [vmem:[%s1844_s3 + $0x38] sm:$0xff]  }
  0x17   : > { %1360 = vmatpush3.bf16.msra.mxu0 %v1474_v0  ;;  %s1317_s28 = sshll.u32 %s1668_s27, 5  ;;  %1370 = vmatpush3.bf16.msra.mxu1 %v1479_v5  ;;  %v1268_v10 = vld [vmem:[%s1843_s2] ss:$0 sm:$0xff]  ;;  %v1482_v25 = vld [vmem:[%s1844_s3 + $0x8] sm:$0xff]   ;;  %v1486_v49 = vld [vmem:[%s1844_s3 + $0x30] sm:$0xff]   ;;  %s1319_s20 = sshll.u32 %s1668_s27, 3 }
  0x18   : > { %s377_s11 = scalar_lea.vmem %s1855_s0, %s1317_s28  ;;  %1385 = vmatprep.subr.bf16.mxu0 %v1557_v6  ;;  %1371 = vmatprep.subr.bf16.mxu1 %v1557_v6  ;;  %s1706_s21 = scalar_lea.vmem %s1848_s7, %s1317_s28  ;;  %v1483_v35 = vld [vmem:[%s1844_s3] sm:$0xff]   ;;  %v1487_v51 = vld [vmem:[%s1846_s5 + $0x8] sm:$0xff]   ;;  %v1488_v52 = vld [vmem:[%s1846_s5 + $0x18] sm:$0xff]   ;;  %vm1080_vm4 = vcmask 254976   ;;  %vm1090_vm5 = vcmask 253952  }
  0x19   : > { %v1475_v1 = vld [vmem:[%s377_s11] sm:$0xff]   ;;  %v1476_v2 = vld [vmem:[%s377_s11 + $0x8] sm:$0xff]   ;;  %v1477_v3 = vld [vmem:[%s377_s11 + $0x10] sm:$0xff]   ;;  %1373 = vmatprep.mubr.msk.bf16.mxu1 %vm1558_vm1, %v1557_v6  ;;  %s387_s26 = scalar_lea.vmem %s1849_s8, %s1319_s20  ;;  %s1267_s28 = sshll.u32 %s1668_s27, 1 }
  0x1a   : > { %1361 = vmatprep.mubr.msk.bf16.mxu0 %vm436_vm0, %v1475_v1  ;;  %v1478_v4 = vld [vmem:[%s377_s11 + $0x18] sm:$0xff]   ;;  %v1489_v53 = vld [vmem:[%s1846_s5] sm:$0xff]   ;;  %v1490_v54 = vld [vmem:[%s1846_s5 + $0x10] sm:$0xff]   ;;  %s391_s11 = scalar_lea.vmem %s1850_s9, %s1267_s28  ;;  %s1314_s27 = sshll.u32 %s1636_s17, 4 }
  0x1b   : > { %1362 = vmatmul.mubr.msk.bf16.vlgmr.msra.gmra.mxu0 %vm436_vm0, %v1476_v2  ;;  %1372 = vmatpush3.bf16.msra.mxu1 %v1480_v7  ;;  %s1128_s20 = sshll.u32 %s372_s18, 4  ;;  %s1107_s28 = scalar_lea.sflag [#allocation3], %s371_s12  ;;  %s1129_s20 = int_to_ptr.vmem [resolvable:$true] %s1128_s20 }
  0x1c   : > { %1365 = vmatprep.mubr.msk.bf16.mxu0 %vm436_vm0, %v1477_v3  ;;  %1377 = vmatprep.subr.bf16.mxu1 %v1557_v6  ;;  %s1495_s29 = scalar_lea.vmem %s1129_s20, 16 }
  0x1d   : > { %1386 = vmatpush3.bf16.msra.mxu0 %v1481_v8  ;;  %v1298_v8 = vld [vmem:[%s1845_s4] ss:$0 sm:$0xff]  ;;  %p1496_p11 = scmp.ne.s32.totalorder %s1129_s20, %s1495_s29 }
  0x1e   : > { %1387 = vmatprep.subr.bf16.mxu0 %v1557_v6 }
  0x1f   : > { %p1497_p12 = pnand %p1496_p11, %p1653_p5 }
  0x21   : > { %1388 = vmatpush3.bf16.msra.mxu0 %v1484_v9  ;;  %p1498_p13 = pneg %p1497_p12 }
  0x22   : > { %1401 = vmatprep.subr.bf16.mxu0 %v1557_v6 }
  0x23   : > { %1366 = vmatmul.mubr.msk.bf16.gmra.mxu0 %vm436_vm0, %v1478_v4 }
  0x24   : > { %1389 = vmatprep.mubr.msk.bf16.mxu0 %vm1558_vm1, %v1557_v6 }
  0xdb   : > { %v1363_v11 = vpop.f32.mrf.mxu0 }
  0xdc   : > { %v492_v12 = vadd.f32 %v1363_v11, %v1268_v10 }
  0xdd   : > { %v483_v13 = vpop.f32.mrf.mxu0 }
  0xde   : > { %v516_v14 = vmax.f32 %v492_v12, 0.0  ;;  %v484_v15 = vadd.f32 %v1268_v10, %v483_v13 }
  0xdf   : > { %v1364_v16 = vpop.f32.mrf.mxu0 }
  0xe0   : > { %v1322_v17 = vpack.c.bf16 %v516_v14, %v516_v14  ;;  %v514_v18 = vmax.f32 %v484_v15, 0.0  ;;  %v495_v19 = vadd.f32 %v1364_v16, %v1268_v10 }
  0xe1   : > { %v486_v20 = vpop.f32.mrf.mxu0 }
  0xe2   : > { %557 = vst.msk [vmem:[%s1706_s21 + $0x8] sm:$0xf] %vm554_vm2, %v1322_v17  ;;  %v1320_v21 = vpack.c.bf16 %v514_v18, %v514_v18  ;;  %v517_v22 = vmax.f32 %v495_v19, 0.0  ;;  %v487_v23 = vadd.f32 %v1268_v10, %v486_v20  ;;  %v1491_v20 = vld [vmem:[%s1846_s5 + $0x38] sm:$0xff]  }
  0xe3   : > { %v1367_v24 = vpop.f32.mrf.mxu0 }
  0xe4   : > { %555 = vst.msk [vmem:[%s1706_s21] sm:$0xf] %vm554_vm2, %v1320_v21  ;;  %v523_v26 = vpack.c.bf16 %v517_v22, %v516_v14  ;;  %v1323_v27 = vpack.c.bf16 %v517_v22, %v517_v22  ;;  %v515_v28 = vmax.f32 %v487_v23, 0.0  ;;  %v508_v29 = vadd.f32 %v1367_v24, %v1268_v10  ;;  %v1492_v23 = vld [vmem:[%s1846_s5 + $0x28] sm:$0xff]  }
  0xe5   : > { %v499_v30 = vpop.f32.mrf.mxu0 }
  0xe6   : > { %558 = vst.msk [vmem:[%s1706_s21 + $0xc] sm:$0xf] %vm554_vm2, %v1323_v27  ;;  %v1321_v31 = vpack.c.bf16 %v515_v28, %v515_v28  ;;  %v520_v32 = vmax.f32 %v508_v29, 0.0  ;;  %v500_v33 = vadd.f32 %v1268_v10, %v499_v30  ;;  %1374 = vmatmul.mubr.msk.bf16.vlgmr.msra.gmra.mxu1 %vm583_vm3, %v523_v26  ;;  %v522_v44 = vpack.c.bf16 %v515_v28, %v514_v18  ;;  %v1494_v26 = vld [vmem:[%s1846_s5 + $0x20] sm:$0xff]  }
  0xe7   : > { %1378 = vmatpush3.bf16.msra.mxu1 %v1482_v25  ;;  %v1368_v34 = vpop.f32.mrf.mxu0  ;;  %1381 = vmatprep.mubr.msk.bf16.mxu1 %vm1558_vm1, %v1557_v6  ;;  %v1493_v25 = vld [vmem:[%s1846_s5 + $0x30] sm:$0xff]  }
  0xe8   : > { %556 = vst.msk [vmem:[%s1706_s21 + $0x4] sm:$0xf] %vm554_vm2, %v1321_v31  ;;  %v1326_v36 = vpack.c.bf16 %v520_v32, %v520_v32  ;;  %v518_v37 = vmax.f32 %v500_v33, 0.0  ;;  %v511_v38 = vadd.f32 %v1368_v34, %v1268_v10  ;;  %1379 = vmatprep.subr.bf16.mxu1 %v1557_v6 }
  0xe9   : > { %v502_v39 = vpop.f32.mrf.mxu0 }
  0xea   : > { %561 = vst.msk [vmem:[%s1706_s21 + $0x18] sm:$0xf] %vm554_vm2, %v1326_v36  ;;  %v1324_v40 = vpack.c.bf16 %v518_v37, %v518_v37  ;;  %v521_v41 = vmax.f32 %v511_v38, 0.0  ;;  %v503_v42 = vadd.f32 %v1268_v10, %v502_v39 }
  0xeb   : > { %1380 = vmatpush3.bf16.msra.mxu1 %v1483_v35 }
  0xec   : > { %559 = vst.msk [vmem:[%s1706_s21 + $0x10] sm:$0xf] %vm554_vm2, %v1324_v40  ;;  %v1327_v45 = vpack.c.bf16 %v521_v41, %v521_v41  ;;  %v519_v46 = vmax.f32 %v503_v42, 0.0  ;;  %1393 = vmatprep.subr.bf16.mxu1 %v1557_v6  ;;  %v525_v50 = vpack.c.bf16 %v521_v41, %v520_v32  ;;  %v1313_v41 = vld [vmem:[%s1847_s6] ss:$0 sm:$0xff] }
  0xee   : > { %562 = vst.msk [vmem:[%s1706_s21 + $0x1c] sm:$0xf] %vm554_vm2, %v1327_v45  ;;  %v524_v47 = vpack.c.bf16 %v519_v46, %v518_v37  ;;  %v1325_v48 = vpack.c.bf16 %v519_v46, %v519_v46  ;;  %1382 = vmatmul.mubr.msk.bf16.vlgmr.msra.gmra.mxu1 %vm583_vm3, %v522_v44 }
  0xef   : > { %1394 = vmatpush3.bf16.msra.mxu1 %v1485_v43  ;;  %1397 = vmatprep.mubr.msk.bf16.mxu1 %vm1558_vm1, %v1557_v6 }
  0xf0   : > { %560 = vst.msk [vmem:[%s1706_s21 + $0x14] sm:$0xf] %vm554_vm2, %v1325_v48  ;;  %1390 = vmatmul.mubr.msk.bf16.vlgmr.msra.gmra.mxu0 %vm583_vm3, %v524_v47  ;;  %1395 = vmatprep.subr.bf16.mxu1 %v1557_v6 }
  0xf1   : > { %1405 = vmatprep.mubr.msk.bf16.mxu0 %vm1558_vm1, %v1557_v6  ;;  %1402 = vmatpush3.bf16.msra.mxu0 %v1488_v52 }
  0xf2   : > { %1403 = vmatprep.subr.bf16.mxu0 %v1557_v6 }
  0xf3   : > { %1396 = vmatpush3.bf16.msra.mxu1 %v1486_v49 }
  0xf4   : > { %1409 = vmatprep.subr.bf16.mxu1 %v1557_v6 }
  0xf5   : > { %1404 = vmatpush3.bf16.msra.mxu0 %v1490_v54 }
  0xf6   : > { %1398 = vmatmul.mubr.msk.bf16.vlgmr.msra.gmra.mxu1 %vm583_vm3, %v525_v50  ;;  %1417 = vmatprep.subr.bf16.mxu0 %v1557_v6 }
  0xf7   : > { %1413 = vmatprep.mubr.msk.bf16.mxu1 %vm1558_vm1, %v1557_v6  ;;  %1410 = vmatpush3.bf16.msra.mxu1 %v1487_v51 }
  0xf8   : > { %1411 = vmatprep.subr.bf16.mxu1 %v1557_v6 }
  0xfb   : > { %1412 = vmatpush3.bf16.msra.mxu1 %v1489_v53 }
  0xfc   : > { %1425 = vmatprep.subr.bf16.mxu1 %v1557_v6 }
 0x1a6   : > { %v621_v55 = vpop.f32.mrf.mxu1 }
 0x1a8   : > { %v1375_v56 = vpop.f32.mrf.mxu1 }
 0x1aa   : > { %v624_v57 = vpop.f32.mrf.mxu1 }
 0x1ac   : > { %v1376_v58 = vpop.f32.mrf.mxu1 }
 0x1ae   : > { %v677_v59 = vpop.f32.mrf.mxu1 }
 0x1af   : > { %v678_v62 = vadd.f32 %v677_v59, %v621_v55 }
 0x1b0   : > { %v1383_v60 = vpop.f32.mrf.mxu1  ;;  %v737_v61 = vpop.f32.mrf.mxu0 }
 0x1b1   : > { %v744_v3 = vadd.f32 %v737_v61, %v678_v62 }
 0x1b2   : > { %v680_v63 = vpop.f32.mrf.mxu1  ;;  %v1391_v0 = vpop.f32.mrf.mxu0 }
 0x1b3   : > { %v681_v4 = vadd.f32 %v680_v63, %v624_v57 }
 0x1b4   : > { %v1384_v1 = vpop.f32.mrf.mxu1  ;;  %v740_v2 = vpop.f32.mrf.mxu0 }
 0x1b5   : > { %v745_v11 = vadd.f32 %v740_v2, %v681_v4 }
 0x1b6   : > { %v1392_v5 = vpop.f32.mrf.mxu0  ;;  %v799_v7 = vpop.f32.mrf.mxu1 }
 0x1b7   : > { %v806_v9 = vadd.f32 %v799_v7, %v744_v3 }
 0x1b8   : > { %v1399_v10 = vpop.f32.mrf.mxu1 }
 0x1b9   : > { %v815_v12 = vadd.f32 %v1298_v8, %v806_v9 }
 0x1ba   : > { %v802_v13 = vpop.f32.mrf.mxu1 }
 0x1bb   : > { %v817_v14 = vmax.f32 %v815_v12, 0.0  ;;  %v807_v15 = vadd.f32 %v802_v13, %v745_v11 }
 0x1bc   : > { %v1400_v16 = vpop.f32.mrf.mxu1 }
 0x1bd   : > { %v1328_v17 = vpack.c.bf16 %v817_v14, %v817_v14  ;;  %v816_v18 = vadd.f32 %v1298_v8, %v807_v15 }
 0x1bf   : > { %827 = vst.msk [vmem:[%s387_s26] sm:$0xf] %vm554_vm2, %v1328_v17  ;;  %v818_v19 = vmax.f32 %v816_v18, 0.0 }
 0x1c1   : > { %v819_v21 = vpack.c.bf16 %v818_v19, %v817_v14  ;;  %v1329_v22 = vpack.c.bf16 %v818_v19, %v818_v19 }
 0x1c3   : > { %828 = vst.msk [vmem:[%s387_s26 + $0x4] sm:$0xf] %vm554_vm2, %v1329_v22  ;;  %1414 = vmatmul.mubr.msk.bf16.vlgmr.msra.gmra.mxu1 %vm583_vm3, %v819_v21  ;;  %v837_v24 = vrot.slane %v819_v21, 2  ;;  %v1013_v27 = vrot.slane %v819_v21, 6  ;;  %v952_v28 = vrot.slane %v819_v21, 4  ;;  %s1126_s26 = scalar_lea.hbm %s1851_s10, %s1314_s27 }
 0x1c4   : > { %1426 = vmatpush3.bf16.msra.mxu1 %v1491_v20  ;;  %1429 = vmatprep.mubr.msk.bf16.mxu1 %vm1558_vm1, %v1557_v6 }
 0x1c5   : > { %1406 = vmatmul.mubr.msk.bf16.vlgmr.msra.gmra.mxu0 %vm583_vm3, %v837_v24  ;;  %1427 = vmatprep.subr.bf16.mxu1 %v1557_v6 }
 0x1c6   : > { %1418 = vmatpush3.bf16.msra.mxu0 %v1492_v23  ;;  %1421 = vmatprep.mubr.msk.bf16.mxu0 %vm1558_vm1, %v1557_v6 }
 0x1c7   : > { %1419 = vmatprep.subr.bf16.mxu0 %v1557_v6 }
 0x1c8   : > { %1428 = vmatpush3.bf16.msra.mxu1 %v1493_v25 }
 0x1ca   : > { %1420 = vmatpush3.bf16.msra.mxu0 %v1494_v26 }
 0x1cb   : > { %1430 = vmatmul.mubr.msk.bf16.vlgmr.msra.gmra.mxu1 %vm583_vm3, %v1013_v27 }
 0x1cd   : > { %1422 = vmatmul.mubr.msk.bf16.vlgmr.msra.gmra.mxu0 %vm583_vm3, %v952_v28 }
 0x283   : > { %v942_v29 = vpop.f32.mrf.mxu1 }
 0x285   : > { %v887_v30 = vpop.f32.mrf.mxu0  ;;  %v1415_v31 = vpop.f32.mrf.mxu1 }
 0x286   : > { %v943_v38 = vadd.f32 %v942_v29, %v887_v30 }
 0x287   : > { %v1407_v32 = vpop.f32.mrf.mxu0  ;;  %v945_v33 = vpop.f32.mrf.mxu1 }
 0x289   : > { %v890_v34 = vpop.f32.mrf.mxu0  ;;  %v1416_v35 = vpop.f32.mrf.mxu1 }
 0x28b   : > { %v1408_v36 = vpop.f32.mrf.mxu0  ;;  %v1063_v37 = vpop.f32.mrf.mxu1 }
 0x28d   : > { %v1002_v6 = vpop.f32.mrf.mxu0  ;;  %v1431_v39 = vpop.f32.mrf.mxu1 }
 0x28e   : > { %v1008_v40 = vadd.f32 %v1002_v6, %v943_v38 }
 0x28f   : > { %v1423_v42 = vpop.f32.mrf.mxu0  ;;  %v1066_v43 = vpop.f32.mrf.mxu1 }
 0x290   : > { %v1069_v44 = vadd.f32 %v1063_v37, %v1008_v40 }
 0x291   : > { %v1005_v45 = vpop.f32.mrf.mxu0  ;;  %v1432_v46 = vpop.f32.mrf.mxu1 }
 0x292   : > { %v1077_v47 = vadd.f32 %v1313_v41, %v1069_v44 }
 0x293   : > { %v1424_v48 = vpop.f32.mrf.mxu0 }
 0x294   : > { %v1078_v49 = vmax.f32 %v1077_v47, 0.0 }
 0x296   : > { %v1079_v50 = vpack.c.bf16 %v1078_v49, %v1078_v49  ;;  %v1082_v51 = vsel %vm554_vm2, %v1078_v49, 0.0 }
 0x297   : > { %v1083_v52 = vrot.slane %v1082_v51, 4 }
 0x298   : > { %1081 = vst.msk [vmem:[%s391_s11] sm:$0x3] %vm1080_vm4, %v1079_v50  ;;  %s1499_s11 = sshll.u32 %s1559_s30, 4  ;;  %s1500_s11 = int_to_ptr.vmem [resolvable:$false] %s1499_s11 }
 0x299   : > { %v1084_v53 = vadd.f32 %v1083_v52, %v1082_v51  ;;  %s1501_s17 = scalar_lea.vmem %s1500_s11, 32  ;;  %p1502_p0 = scmp.lt.s32.totalorder %s1129_s20, %s1500_s11 }
 0x29a   : > { %p1503_p1 = scmp.lt.s32.totalorder %s1501_s17, %s1495_s29 }
 0x29b   : > { %v1085_v54 = vrot.slane %v1084_v53, 2 }
 0x29c   : > { %p1504_p2 = por %p1503_p1, %p1502_p0 }
 0x29d   : > { %v1086_v55 = vadd.f32 %v1085_v54, %v1084_v53 }
 0x29e   : > { %p1505_p3 = pnand %p1504_p2, %p1498_p13 }
 0x29f   : > { %v1087_v56 = vrot.slane %v1086_v55, 1 }
 0x2a1   : > { %v1088_v57 = vadd.f32 %v1087_v56, %v1086_v55 }
 0x2a3   : > { %v1089_v58 = vmul.f32 0.25, %v1088_v57 }
 0x2a5   : > { %1091 = vst.msk [vmem:[%s372_s18] sm:$0x1] %vm1090_vm5, %v1089_v58 }
 0x2a6   : > { %1508 = shalt.err (!%p1505_p3)
}
 0x2a7   : > { %s1509_s0 = scalar_lea.hbm %s1126_s26, 16  ;;  %s1513_s18 = scalar_lea.hbm %s1851_s10, 32 }
 0x2a8   : > { %p1510_p4 = scmp.ne.s32.totalorder %s1126_s26, %s1509_s0  ;;  %p1514_p9 = scmp.lt.s32.totalorder %s1126_s26, %s1851_s10 }
 0x2a9   : > { %p1515_p10 = scmp.lt.s32.totalorder %s1513_s18, %s1509_s0 }
 0x2aa   : > { %p1511_p7 = pnand %p1510_p4, %p1653_p5 }
 0x2ab   : > { %p1516_p11 = por %p1515_p10, %p1514_p9 }
 0x2ac   : > { %p1512_p8 = pneg %p1511_p7 }
 0x2ae   : > { %p1517_p12 = pnand %p1516_p11, %p1512_p8 }
 0x2b0   : > { %1520 = shalt.err (!%p1517_p12)
}
 0x2b1   : > { %1433 = dma.vmem_to_hbm [thread:$0]  (%p1653_p5), %s1129_s20, 16, %s1126_s26, %s1107_s28  }
 0x2b2 PF: > { %p1439_p13 = scmp.ge.s32.totalorder %s1555_s16, 2  ;;  %s1163_s29 = sand.u32 1, %s1543_s13  }
 0x2b3   : > { %s1164_s30 = scalar_lea.sflag [#allocation3], %s1163_s29 }
 0x2b4   : > { %p1436_p0 = pnand %p1439_p13, %p1657_p6 }
 0x2b6   : > { %p1437_p1 = pneg %p1436_p0 }
 0x2b8   : > { %1538 = dma.done.wait (%p1437_p1), %s1164_s30, 16  }
 0x2b9   : > { %1540 = vsyncadd (%p1437_p1), %s1164_s30, 4294967280  ;;  %p21_p2 = scmp.ge.s32.totalorder %s1640_s19, 4   ;;  %s1856_s13 = smov %s1547_s14 }
 0x2ba   : > { %s1857_s14 = smov %s1551_s15  ;;  %s1858_s15 = smov %s1651_s22 }
 0x2bb   : > { %s1859_s16 = smov %s1640_s19  ;;  %23 = sbr.rel (!%p21_p2) target bundleno = 5 (0x5), region = 119 }
 0x2c0   :  { %1168 = vsyncpa [#allocation3], 1 }
 0x2c1   :  { %1170 = vsyncpa [#allocation3 + $0x1], 1 }

</bundles_post_ra>
